<compile_context>
chip_gen: v7x
topology: tpu7x:2x2x1
jax: 0.10.0
libtpu: 0.0.40
codegen_flags: <defaults>
</compile_context>

<pallas_src>
import jax
import jax.numpy as jnp
from jax.experimental import pallas as pl
from jax.experimental.pallas import tpu as pltpu


def _swish_kernel(x_ref, o_ref):
    x32 = x_ref[...].astype(jnp.float32)
    # Swish(x) = x * sigmoid(x); the transcendental inside sigmoid runs on the
    # EUP slot, the multiply on the VPU — both hidden under the HBM DMA.
    o_ref[...] = (x32 * jax.nn.sigmoid(x32)).astype(o_ref.dtype)


def _choose_layout(n: int, itemsize: int):
    """Pick (lane_width, pad, rows, tile_rows) for a lane-dense 2D slab."""
    candidates = (4096, 2048, 1024, 512, 256, 128)

    lane_width = None
    pad = 0
    # Prefer a width that also makes the row count a multiple of 8
    # (cleanest (8,128) tiling, no ragged last block at all).
    for w in candidates:
        if n % w == 0 and (n // w) % 8 == 0:
            lane_width = w
            break
    if lane_width is None:
        for w in candidates:
            if n % w == 0:
                lane_width = w
                break
    if lane_width is None:
        # Rare fallback: element count not a multiple of 128 -> minimal pad.
        lane_width = 128
        pad = (-n) % 128

    rows = (n + pad) // lane_width

    # Target ~2 MiB per block (per array).  Double-buffered in + out -> ~8 MiB
    # VMEM, safe under default scoped limits on v5e/v6e/v7x, and past the
    # measured HBM-roofline plateau.
    target_block_bytes = 2 * 1024 * 1024
    tile_rows = target_block_bytes // (lane_width * itemsize)
    tile_rows = max(8, (tile_rows // 8) * 8)
    if tile_rows >= rows:
        # Single block spanning all rows: block dim == full array dim, which
        # is always a legal block shape regardless of divisibility by 8.
        tile_rows = rows
    return lane_width, pad, rows, tile_rows


def swish(x: jax.Array) -> jax.Array:
    """Applies Swish(x) = x * sigmoid(x) elementwise. Preserves shape & dtype."""
    orig_shape = x.shape
    orig_dtype = x.dtype

    n = x.size
    itemsize = jnp.dtype(orig_dtype).itemsize
    lane_width, pad, rows, tile_rows = _choose_layout(n, itemsize)

    if pad == 0:
        # Pure reshape of a contiguous tensor: no HBM copy.
        x2d = jnp.reshape(x, (rows, lane_width))
    else:
        x_flat = jnp.reshape(x, (-1,))
        x_flat = jnp.pad(x_flat, (0, pad))
        x2d = jnp.reshape(x_flat, (rows, lane_width))

    grid = (pl.cdiv(rows, tile_rows),)

    out2d = pl.pallas_call(
        _swish_kernel,
        out_shape=jax.ShapeDtypeStruct((rows, lane_width), orig_dtype),
        grid_spec=pltpu.PrefetchScalarGridSpec(
            num_scalar_prefetch=0,
            grid=grid,
            in_specs=[pl.BlockSpec((tile_rows, lane_width), lambda i: (i, 0))],
            out_specs=pl.BlockSpec((tile_rows, lane_width), lambda i: (i, 0)),
        ),
        compiler_params=pltpu.CompilerParams(
            dimension_semantics=("parallel",),
        ),
    )(x2d)

    if pad == 0:
        return jnp.reshape(out2d, orig_shape)
    out_flat = jnp.reshape(out2d, (-1,))[:n]
    return jnp.reshape(out_flat, orig_shape)


if __name__ == "__main__":
    key = jax.random.PRNGKey(0)

    # NCHW input, consistent with PyTorch conv-style tensors.
    x = jax.random.normal(key, (2, 4, 16, 16), dtype=jnp.float32)
    out = jax.block_until_ready(swish(x))
    ref = x * jax.nn.sigmoid(x)
    assert out.shape == x.shape and out.dtype == x.dtype
    assert jnp.allclose(out, ref, atol=1e-6, rtol=1e-6)

    # Exercise the non-multiple-of-128 fallback (pad) path.
    x_odd = jax.random.normal(jax.random.PRNGKey(1), (3, 5, 7), dtype=jnp.float32)
    out_odd = jax.block_until_ready(swish(x_odd))
    ref_odd = x_odd * jax.nn.sigmoid(x_odd)
    assert out_odd.shape == x_odd.shape and out_odd.dtype == x_odd.dtype
    assert jnp.allclose(out_odd, ref_odd, atol=1e-6, rtol=1e-6)

    # A larger multi-block case (multiple grid steps, ragged last row block).
    x_big = jax.random.normal(jax.random.PRNGKey(3), (3, 8, 64, 128), dtype=jnp.float32)
    out_big = jax.block_until_ready(swish(x_big))
    ref_big = x_big * jax.nn.sigmoid(x_big)
    assert out_big.shape == x_big.shape and out_big.dtype == x_big.dtype
    assert jnp.allclose(out_big, ref_big, atol=1e-6, rtol=1e-6)

    # bf16 input: kernel computes in f32 and casts back on store.
    x_bf16 = jax.random.normal(jax.random.PRNGKey(2), (2, 4, 16, 16), dtype=jnp.bfloat16)
    out_bf16 = jax.block_until_ready(swish(x_bf16))
    ref_bf16 = (x_bf16.astype(jnp.float32) * jax.nn.sigmoid(x_bf16.astype(jnp.float32))).astype(jnp.bfloat16)
    assert out_bf16.shape == x_bf16.shape and out_bf16.dtype == x_bf16.dtype
    assert jnp.allclose(out_bf16.astype(jnp.float32), ref_bf16.astype(jnp.float32), atol=1e-2, rtol=1e-2)

    print("KERNEL_OK")
</pallas_src>

<mosaic_0001>
module attributes {stable_mosaic.version = 11 : i64} {
  func.func @_swish_kernel(%arg0: i32, %arg1: memref<8x256xf32, #tpu.memory_space<vmem>>, %arg2: memref<8x256xf32, #tpu.memory_space<vmem>>) attributes {dimension_semantics = [#tpu.dimension_semantics<parallel>], iteration_bounds = array<i64: 1>, scalar_prefetch = 0 : i64, scratch_operands = 0 : i64, tpu.core_type = #tpu.core_type<tc>, window_params = [{transform_indices = @transform_0, window_bounds = array<i64: 8, 256>}, {transform_indices = @transform_1, window_bounds = array<i64: 8, 256>}]} {
    %c0 = arith.constant 0 : index
    %c0_0 = arith.constant 0 : index
    %0 = vector.load %arg1[%c0, %c0_0] : memref<8x256xf32, #tpu.memory_space<vmem>>, vector<8x256xf32>
    %1 = arith.negf %0 : vector<8x256xf32>
    %2 = math.exp %1 : vector<8x256xf32>
    %cst = arith.constant 1.000000e+00 : f32
    %3 = vector.broadcast %cst : f32 to vector<8x256xf32>
    %4 = arith.addf %3, %2 : vector<8x256xf32>
    %5 = arith.divf %3, %4 : vector<8x256xf32>
    %6 = arith.mulf %0, %5 : vector<8x256xf32>
    %c0_1 = arith.constant 0 : index
    %c0_2 = arith.constant 0 : index
    %7 = vector.load %arg2[%c0_1, %c0_2] : memref<8x256xf32, #tpu.memory_space<vmem>>, vector<8x256xf32>
    tpu.vector_store %arg2[%c0_1, %c0_2], %6 {strides = array<i32>} : memref<8x256xf32, #tpu.memory_space<vmem>>, vector<8x256xf32>,
    return
  }
  func.func @transform_0(%arg0: i32) -> (i32, i32) {
    %c0_i32 = arith.constant 0 : i32
    %c0_i32_0 = arith.constant 0 : i32
    return %arg0, %c0_i32 : i32, i32
  }
  func.func @transform_1(%arg0: i32) -> (i32, i32) {
    %c0_i32 = arith.constant 0 : i32
    %c0_i32_0 = arith.constant 0 : i32
    return %arg0, %c0_i32 : i32, i32
  }
}

</mosaic_0001>

<bundles_post_ra>
// kernel: tpu_custom_call.1
= control target key start
LH: loop header
LB: loop body
LE: loop exit
PB: predicated region body
PF: predicated region fallthrough
CT: control target
= control target key end

     0   :  { %6 = vsyncpa [#allocation3], 0  ;;  %s150_s0 = inlined_call_operand.hbm [shape: f32[8,256], index: 0, kind: input, shape index: {}]   ;;  %s151_s1 = inlined_call_operand.hbm [shape: f32[8,256], index: 1, kind: output, shape index: {}]  }
   0x1   :  { %7 = vsyncpa [#allocation4], 0  ;;  %s114_s6 = smov [#allocation2]   ;;  %s66_s10 = scalar_lea.hbm %s150_s0, 256 }
   0x2   :  { %s14_s7 = sshll.u32 %s114_s6, 4  ;;  %p67_p0 = scmp.ne.s32.totalorder %s150_s0, %s66_s10  ;;  %s15_s7 = int_to_ptr.vmem [resolvable:$true] %s14_s7 }
   0x3   :  { %p70_p1 = scmp.lt.u32.totalorder %s66_s10, %s150_s0 }
   0x5   :  { %p72_p2 = pnand %p70_p1, %p67_p0 }
   0x7   :  { %75 = shalt.err (!%p72_p2)
}
   0x8   :  { %s76_s15 = scalar_lea.vmem %s15_s7, 256  ;;  %p81_p4 = scmp.lt.s32.totalorder %s15_s7, %s15_s7 }
   0x9   :  { %p77_p3 = scmp.ne.s32.totalorder %s15_s7, %s76_s15  ;;  %p82_p5 = scmp.lt.s32.totalorder %s76_s15, %s76_s15 }
   0xb   :  { %p83_p6 = por %p82_p5, %p81_p4 }
   0xd   :  { %p84_p7 = pnand %p83_p6, %p77_p3 }
   0xf   :  { %87 = shalt.err (!%p84_p7)
}
  0x10   :  { %17 = dma.hbm_to_vmem [thread:$0]  %s150_s0, 256, %s15_s7, [#allocation3]  }
  0x11   :  { %110 = dma.done.wait [#allocation3], 256  }
  0x12   :  { %111 = vsyncadd [#allocation3], 4294967040  ;;  %v21_v0 = vld [vmem:[#allocation2] sm:$0xff]  ;;  %v22_v1 = vld [vmem:[#allocation2 + $0x8] sm:$0xff]  ;;  %s115_s18 = smov [#allocation5]  }
  0x13   :  { %v54_v2 = vmul.f32 -1.442695, %v21_v0  ;;  %v55_v3 = vmul.f32 -1.442695, %v22_v1  ;;  %s45_s19 = sshll.u32 %s115_s18, 4  ;;  %s46_s19 = int_to_ptr.vmem [resolvable:$true] %s45_s19 }
  0x14   :  { %s88_s0 = scalar_lea.vmem %s46_s19, 256  ;;  %p93_p9 = scmp.lt.s32.totalorder %s46_s19, %s46_s19 }
  0x15   :  { %58 = vpow2.f32 %v54_v2  ;;  %p89_p8 = scmp.ne.s32.totalorder %s46_s19, %s88_s0  ;;  %p94_p10 = scmp.lt.s32.totalorder %s88_s0, %s88_s0 }
  0x16   :  { %60 = vpow2.f32 %v55_v3 }
  0x17   :  { %p95_p11 = por %p94_p10, %p93_p9 }
  0x19   :  { %p96_p12 = pnand %p95_p11, %p89_p8 }
  0x1f   :  { %v59_v4 = vpop.eup %58 }
  0x20   :  { %v61_v5 = vpop.eup %60  ;;  %v29_v6 = vadd.f32 1.0, %v59_v4 }
  0x21   :  { %v30_v7 = vadd.f32 1.0, %v61_v5 }
  0x22   :  { %62 = vrcp.f32 %v29_v6 }
  0x23   :  { %64 = vrcp.f32 %v30_v7 }
  0x2c   :  { %v63_v8 = vpop.eup %62 }
  0x2d   :  { %v65_v9 = vpop.eup %64  ;;  %v35_v10 = vmul.f32 %v63_v8, %v21_v0 }
  0x2e   :  { %v36_v11 = vmul.f32 %v65_v9, %v22_v1 }
  0x2f   :  { %37 = vst [vmem:[#allocation5] sm:$0xff] %v35_v10 }
  0x30   :  { %38 = vst [vmem:[#allocation5 + $0x8] sm:$0xff] %v36_v11 }
  0x31   :  { %99 = shalt.err (!%p96_p12)
}
  0x32   :  { %s100_s22 = scalar_lea.hbm %s151_s1, 256 }
  0x33   :  { %p101_p13 = scmp.ne.s32.totalorder %s151_s1, %s100_s22  ;;  %p104_p0 = scmp.lt.u32.totalorder %s100_s22, %s151_s1 }
  0x35   :  { %p106_p1 = pnand %p104_p0, %p101_p13 }
  0x37   :  { %109 = shalt.err (!%p106_p1)
}
  0x38   :  { %48 = dma.vmem_to_hbm [thread:$0]  %s46_s19, 256, %s151_s1, [#allocation4]  }
  0x39   :  { %112 = dma.done.wait [#allocation4], 256  }
  0x3a   :  { %113 = vsyncadd [#allocation4], 4294967040 }
  0x3b   :  { %52 = vsyncpa [#allocation3], 1 }
  0x3c   :  { %53 = vsyncpa [#allocation4], 1 }

</bundles_post_ra>
